<compile_context>
chip_gen: v5e
topology: v5e:2x2
jax: 0.10.0
libtpu: 0.0.40
codegen_flags: <defaults>
</compile_context>

<pallas_src>
import jax
import jax.numpy as jnp
from jax.experimental import pallas as pl
from jax.experimental.pallas import tpu as pltpu  # noqa: F401  (TPU backend)

# Constants from the PyTorch module.
K = 3
T = 20
BATCH_SIZE = 32
N_CLASSES = 9
C = N_CLASSES
SEQ = T + 2 * K                      # 26
IN_FEATURES = SEQ * (C + 1)          # 260
OUT_FEATURES = SEQ * C               # 234


def _mlp_kernel(x_ref, w_ref, b_ref, o_ref):
    # Single-tile kernel: everything fits easily in VMEM
    # (32x260 f32 + 260x234 bf16 + 1x234 f32 + 32x234 f32 ~ 0.3 MiB).
    x = x_ref[...].astype(jnp.bfloat16)               # (B, IN)   cast on VPU
    w = w_ref[...]                                     # (IN, OUT) bf16 (prepped)
    b = b_ref[...]                                     # (1, OUT)  f32
    acc = jnp.dot(x, w, preferred_element_type=jnp.float32)   # MXU, f32 accum
    o_ref[...] = acc + b                               # f32 epilogue (VPU)


def prepare_params(weight_oi, bias):
    """One-time parameter prep (do NOT call per forward).

    weight_oi : (OUT_FEATURES, IN_FEATURES) float32  -- PyTorch nn.Linear layout
    bias      : (OUT_FEATURES,) float32
    returns   : w_io bf16 (IN, OUT), b_row f32 (1, OUT)
    """
    w_io = jnp.asarray(weight_oi, jnp.float32).T.astype(jnp.bfloat16)
    b_row = jnp.asarray(bias, jnp.float32).reshape(1, OUT_FEATURES)
    return w_io, b_row


def mlp_model_forward(x_bsc, w_io, b_row):
    """Pallas implementation of MLPModel.forward.

    x_bsc : (BATCH_SIZE, SEQ, C+1) float32
    w_io  : (IN_FEATURES, OUT_FEATURES) bfloat16   from prepare_params()
    b_row : (1, OUT_FEATURES) float32              from prepare_params()
    returns: (BATCH_SIZE, OUT_FEATURES) float32    (flat logits, like PyTorch)
    """
    # == inputs.reshape(batch_size, -1); contiguous reshape, no dtype cast here.
    x2d = x_bsc.reshape(BATCH_SIZE, IN_FEATURES)

    cost = pl.CostEstimate(
        flops=2 * BATCH_SIZE * IN_FEATURES * OUT_FEATURES,
        transcendentals=0,
        bytes_accessed=(
            BATCH_SIZE * IN_FEATURES * 4          # x   (f32)
            + IN_FEATURES * OUT_FEATURES * 2      # W   (bf16)
            + OUT_FEATURES * 4                    # b   (f32)
            + BATCH_SIZE * OUT_FEATURES * 4       # out (f32)
        ),
    )

    return pl.pallas_call(
        _mlp_kernel,
        out_shape=jax.ShapeDtypeStruct((BATCH_SIZE, OUT_FEATURES), jnp.float32),
        in_specs=[
            pl.BlockSpec((BATCH_SIZE, IN_FEATURES), lambda: (0, 0)),
            pl.BlockSpec((IN_FEATURES, OUT_FEATURES), lambda: (0, 0)),
            pl.BlockSpec((1, OUT_FEATURES), lambda: (0, 0)),
        ],
        out_specs=pl.BlockSpec((BATCH_SIZE, OUT_FEATURES), lambda: (0, 0)),
        cost_estimate=cost,
    )(x2d, w_io, b_row)


if __name__ == "__main__":
    key = jax.random.PRNGKey(0)
    kx, kw, kb = jax.random.split(key, 3)

    # Deterministic synthetic parameters, in PyTorch nn.Linear(IN, OUT) layout:
    # weight is (out_features, in_features).
    bound = 1.0 / (IN_FEATURES ** 0.5)
    weight_oi = jax.random.uniform(
        kw, (OUT_FEATURES, IN_FEATURES), minval=-bound, maxval=bound,
        dtype=jnp.float32,
    )
    bias = jax.random.uniform(
        kb, (OUT_FEATURES,), minval=-bound, maxval=bound, dtype=jnp.float32
    )

    # One-time parameter prep (transpose + bf16 cast), hoisted out of forward.
    w_io, b_row = prepare_params(weight_oi, bias)
    w_io, b_row = jax.block_until_ready((w_io, b_row))

    # Example input: (batch, T+2K, c+1) — the shape MLPModel.forward consumes.
    x = jax.random.normal(kx, (BATCH_SIZE, SEQ, C + 1), dtype=jnp.float32)

    fwd = jax.jit(mlp_model_forward)
    out = fwd(x, w_io, b_row)
    out = jax.block_until_ready(out)

    # Sanity check against plain-JAX f32 reference (bf16 weights/activations
    # inside the kernel -> loosened tolerance).
    ref = x.reshape(BATCH_SIZE, -1) @ weight_oi.T + bias
    assert out.shape == (BATCH_SIZE, OUT_FEATURES)
    assert jnp.allclose(out, ref, atol=5e-2, rtol=5e-2), (
        float(jnp.max(jnp.abs(out - ref)))
    )

    print("KERNEL_OK")
</pallas_src>

<mosaic_0001>
module attributes {stable_mosaic.version = 11 : i64} {
  func.func @_mlp_kernel(%arg0: memref<32x260xf32, #tpu.memory_space<vmem>>, %arg1: memref<260x234xbf16, #tpu.memory_space<vmem>>, %arg2: memref<1x234xf32, #tpu.memory_space<vmem>>, %arg3: memref<32x234xf32, #tpu.memory_space<vmem>>) attributes {dimension_semantics = [], scalar_prefetch = 0 : i64, scratch_operands = 0 : i64, tpu.core_type = #tpu.core_type<tc>} {
    %c0 = arith.constant 0 : index
    %c0_0 = arith.constant 0 : index
    %0 = vector.load %arg0[%c0, %c0_0] : memref<32x260xf32, #tpu.memory_space<vmem>>, vector<32x260xf32>
    %1 = arith.truncf %0 : vector<32x260xf32> to vector<32x260xbf16>
    %c0_1 = arith.constant 0 : index
    %c0_2 = arith.constant 0 : index
    %2 = vector.load %arg1[%c0_1, %c0_2] : memref<260x234xbf16, #tpu.memory_space<vmem>>, vector<260x234xbf16>
    %c0_3 = arith.constant 0 : index
    %c0_4 = arith.constant 0 : index
    %3 = vector.load %arg2[%c0_3, %c0_4] : memref<1x234xf32, #tpu.memory_space<vmem>>, vector<1x234xf32>
    %cst = arith.constant dense<0.000000e+00> : vector<32x234xf32>
    %4 = tpu.matmul %1, %2, %cst {dimension_numbers = #tpu.dot_dimension_numbers<[1], [0], [0], [1], [0, 0, 1, 1], [], []>} : vector<32x260xbf16>, vector<260x234xbf16>, vector<32x234xf32> -> vector<32x234xf32>
    %5 = vector.broadcast %3 : vector<1x234xf32> to vector<32x234xf32>
    %6 = arith.addf %4, %5 : vector<32x234xf32>
    %c0_5 = arith.constant 0 : index
    %c0_6 = arith.constant 0 : index
    %7 = vector.load %arg3[%c0_5, %c0_6] : memref<32x234xf32, #tpu.memory_space<vmem>>, vector<32x234xf32>
    tpu.vector_store %arg3[%c0_5, %c0_6], %6 {strides = array<i32>} : memref<32x234xf32, #tpu.memory_space<vmem>>, vector<32x234xf32>,
    return
  }
}

</mosaic_0001>

<bundles_post_ra>
// kernel: mlp_model_forward.1
= control target key start
LH: loop header
LB: loop body
LE: loop exit
PB: predicated region body
PF: predicated region fallthrough
CT: control target
= control target key end

     0   :  { %vm245_vm0 = vcmask 1041408   ;;  %vm238_vm1 = vcmask 31744   ;;  %s865_s0 = inlined_call_operand.vmem [shape: f32[32,260], index: 0, kind: input, shape index: {}]   ;;  %s866_s1 = inlined_call_operand.vmem [shape: bf16[260,234], index: 1, kind: input, shape index: {}]   ;;  %s867_s2 = inlined_call_operand.vmem [shape: f32[1,234], index: 2, kind: input, shape index: {}]   ;;  %s868_s3 = inlined_call_operand.hbm [shape: f32[32,234], index: 3, kind: output, shape index: {}]  }
   0x1   :  { %v451_v0 = vld [vmem:[%s866_s1 + $0x70] sm:$0xf]  ;;  %v540_v1 = vld [vmem:[%s866_s1 + $0x74] sm:$0xf0]  ;;  %v539_v5 = vld [vmem:[%s866_s1 + $0x74] sm:$0xf] }
   0x2   :  { %v515_v2 = vld [vmem:[%s866_s1 + $0xf0] sm:$0xf]  ;;  %v452_v3 = vor.u32 %v540_v1, %v451_v0  ;;  %v556_v4 = vld [vmem:[%s866_s1 + $0xf4] sm:$0xf0]  ;;  %v453_v6 = vld [vmem:[%s866_s1 + $0x78] sm:$0xf0] }
   0x3   :  { %v516_v7 = vor.u32 %v556_v4, %v515_v2  ;;  %v456_v8 = vor.u32 %v539_v5, %v453_v6  ;;  %v631_v9 = vld [vmem:[%s866_s1 + $0x100] sm:$0x33]  ;;  %v18_v11 = vld [vmem:[%s865_s0 + $0x10] sm:$0xff]  ;;  %v538_v13 = vld [vmem:[%s866_s1 + $0x64] sm:$0xf0] }
   0x4   :  { %v443_v10 = vld [vmem:[%s866_s1 + $0x60] sm:$0xf]  ;;  %252 = vmatpush.bf16.msra.mxu0 %v452_v3  ;;  %v170_v12 = vunpack.c.l.b16 %v631_v9  ;;  %v554_v15 = vld [vmem:[%s866_s1 + $0xe4] sm:$0xf0]  ;;  %v537_v18 = vld [vmem:[%s866_s1 + $0x64] sm:$0xf] }
   0x5   :  { %v507_v14 = vld [vmem:[%s866_s1 + $0xe0] sm:$0xf]  ;;  %271 = vmatpush.bf16.msra.mxu1 %v516_v7  ;;  %309 = vmatpush.bf16.msra.mxu3 %v456_v8  ;;  %v444_v16 = vor.u32 %v538_v13, %v443_v10  ;;  %v445_v19 = vld [vmem:[%s866_s1 + $0x68] sm:$0xf0]  ;;  %v555_v23 = vld [vmem:[%s866_s1 + $0xf4] sm:$0xf] }
   0x6   :  { %v508_v17 = vor.u32 %v554_v15, %v507_v14  ;;  %v21_v20 = vld [vmem:[%s865_s0 + $0x28] sm:$0xff]  ;;  %v204_v21 = vpack.c.b16 %v170_v12, %v170_v12  ;;  %v448_v22 = vor.u32 %v537_v18, %v445_v19  ;;  %v517_v24 = vld [vmem:[%s866_s1 + $0xf8] sm:$0xf0]  ;;  %v435_v25 = vld [vmem:[%s866_s1 + $0x50] sm:$0xf] }
   0x7   :  { %v520_v26 = vor.u32 %v555_v23, %v517_v24  ;;  %v536_v27 = vld [vmem:[%s866_s1 + $0x54] sm:$0xf0]  ;;  %v499_v28 = vld [vmem:[%s866_s1 + $0xd0] sm:$0xf]  ;;  %v677_v31 = vpack.c.bf16 %v21_v20, %v18_v11  ;;  %v535_v33 = vld [vmem:[%s866_s1 + $0x54] sm:$0xf]  ;;  %v171_v20 = vunpack.c.h.b16 %v631_v9 }
   0x8   :  { %v552_v29 = vld [vmem:[%s866_s1 + $0xd4] sm:$0xf0]  ;;  %v247_v30 = vsel %vm245_vm0, %v204_v21, 0  ;;  %253 = vmatpush.bf16.msra.mxu0 %v444_v16  ;;  %v436_v32 = vor.u32 %v536_v27, %v435_v25  ;;  %v437_v34 = vld [vmem:[%s866_s1 + $0x58] sm:$0xf0]  ;;  %v24_v10 = vld [vmem:[%s865_s0 + $0x40] sm:$0xff] }
   0x9   :  { %297 = vmatpush.bf16.msra.mxu2 %v247_v30  ;;  %272 = vmatpush.bf16.msra.mxu1 %v508_v17  ;;  %v500_v35 = vor.u32 %v552_v29, %v499_v28  ;;  %v553_v36 = vld [vmem:[%s866_s1 + $0xe4] sm:$0xf]  ;;  %v509_v37 = vld [vmem:[%s866_s1 + $0xe8] sm:$0xf0]  ;;  %v427_v38 = vld [vmem:[%s866_s1 + $0x40] sm:$0xf]  ;;  %v440_v39 = vor.u32 %v535_v33, %v437_v34  ;;  %v205_v34 = vpack.c.b16 %v171_v20, %v171_v20 }
   0xa   :  { %310 = vmatpush.bf16.msra.mxu3 %v448_v22  ;;  %v512_v40 = vor.u32 %v553_v36, %v509_v37  ;;  %v534_v41 = vld [vmem:[%s866_s1 + $0x44] sm:$0xf0]  ;;  %v491_v42 = vld [vmem:[%s866_s1 + $0xc0] sm:$0xf]  ;;  %v533_v44 = vld [vmem:[%s866_s1 + $0x44] sm:$0xf] }
   0xb   :  { %v550_v43 = vld [vmem:[%s866_s1 + $0xc4] sm:$0xf0]  ;;  %v429_v45 = vld [vmem:[%s866_s1 + $0x48] sm:$0xf0]  ;;  %v551_v46 = vld [vmem:[%s866_s1 + $0xd4] sm:$0xf]  ;;  %v428_v47 = vor.u32 %v534_v41, %v427_v38 }
   0xc   :  { %521 = vmatmul.msk.bf16.vlgmr.msra.gmra.mxu2 %vm238_vm1, %v677_v31  ;;  %254 = vmatpush.bf16.msra.mxu0 %v436_v32  ;;  %v501_v48 = vld [vmem:[%s866_s1 + $0xd8] sm:$0xf0]  ;;  %v492_v49 = vor.u32 %v550_v43, %v491_v42  ;;  %v419_v50 = vld [vmem:[%s866_s1 + $0x30] sm:$0xf]  ;;  %v532_v51 = vld [vmem:[%s866_s1 + $0x34] sm:$0xf0]  ;;  %v432_v52 = vor.u32 %v533_v44, %v429_v45 }
   0xd   :  { %328 = vmatpush.bf16.msrb.mxu2 %v520_v26  ;;  %273 = vmatpush.bf16.msra.mxu1 %v500_v35  ;;  %v504_v53 = vor.u32 %v551_v46, %v501_v48  ;;  %v483_v54 = vld [vmem:[%s866_s1 + $0xb0] sm:$0xf]  ;;  %v548_v55 = vld [vmem:[%s866_s1 + $0xb4] sm:$0xf0]  ;;  %v531_v56 = vld [vmem:[%s866_s1 + $0x34] sm:$0xf]  ;;  %v420_v60 = vor.u32 %v532_v51, %v419_v50 }
   0xe   :  { %311 = vmatpush.bf16.msra.mxu3 %v440_v39  ;;  %v421_v57 = vld [vmem:[%s866_s1 + $0x38] sm:$0xf0]  ;;  %v549_v58 = vld [vmem:[%s866_s1 + $0xc4] sm:$0xf]  ;;  %v493_v59 = vld [vmem:[%s866_s1 + $0xc8] sm:$0xf0]  ;;  %v484_v61 = vor.u32 %v548_v55, %v483_v54 }
   0xf   :  { %v411_v62 = vld [vmem:[%s866_s1 + $0x20] sm:$0xf]  ;;  %v530_v63 = vld [vmem:[%s866_s1 + $0x24] sm:$0xf0]  ;;  %v424_v0 = vor.u32 %v531_v56, %v421_v57  ;;  %v496_v1 = vor.u32 %v549_v58, %v493_v59  ;;  %v529_v4 = vld [vmem:[%s866_s1 + $0x24] sm:$0xf] }
  0x10   :  { %255 = vmatpush.bf16.msra.mxu0 %v428_v47  ;;  %v475_v2 = vld [vmem:[%s866_s1 + $0xa0] sm:$0xf]  ;;  %v546_v3 = vld [vmem:[%s866_s1 + $0xa4] sm:$0xf0]  ;;  %v413_v5 = vld [vmem:[%s866_s1 + $0x28] sm:$0xf0]  ;;  %v412_v8 = vor.u32 %v530_v63, %v411_v62 }
  0x11   :  { %329 = vmatpush.bf16.msrb.mxu2 %v512_v40  ;;  %274 = vmatpush.bf16.msra.mxu1 %v492_v49  ;;  %v547_v6 = vld [vmem:[%s866_s1 + $0xb4] sm:$0xf]  ;;  %v485_v7 = vld [vmem:[%s866_s1 + $0xb8] sm:$0xf0]  ;;  %v476_v11 = vor.u32 %v546_v3, %v475_v2  ;;  %v403_v13 = vld [vmem:[%s866_s1 + $0x10] sm:$0xf]  ;;  %v416_v15 = vor.u32 %v529_v4, %v413_v5 }
  0x12   :  { %312 = vmatpush.bf16.msra.mxu3 %v432_v52  ;;  %v27_v12 = vld [vmem:[%s865_s0 + $0x58] sm:$0xff]  ;;  %v488_v16 = vor.u32 %v547_v6, %v485_v7  ;;  %v467_v17 = vld [vmem:[%s866_s1 + $0x90] sm:$0xf]  ;;  %v527_v19 = vld [vmem:[%s866_s1 + $0x14] sm:$0xf] }
  0x13   :  { %v528_v14 = vld [vmem:[%s866_s1 + $0x14] sm:$0xf0]  ;;  %v405_v21 = vld [vmem:[%s866_s1 + $0x18] sm:$0xf0]  ;;  %v545_v22 = vld [vmem:[%s866_s1 + $0xa4] sm:$0xf]  ;;  %v33_v24 = vpack.c.bf16 %v27_v12, %v24_v10 }
  0x14   :  { %256 = vmatpush.bf16.msra.mxu0 %v420_v60  ;;  %v544_v18 = vld [vmem:[%s866_s1 + $0x94] sm:$0xf0]  ;;  %v477_v23 = vld [vmem:[%s866_s1 + $0xa8] sm:$0xf0]  ;;  %v404_v25 = vor.u32 %v528_v14, %v403_v13  ;;  %v395_v9 = vld [vmem:[%s866_s1] sm:$0xf]  ;;  %v408_v29 = vor.u32 %v527_v19, %v405_v21 }
  0x15   :  { %330 = vmatpush.bf16.msrb.mxu2 %v504_v53  ;;  %275 = vmatpush.bf16.msra.mxu1 %v484_v61  ;;  %v468_v26 = vor.u32 %v544_v18, %v467_v17  ;;  %v526_v27 = vld [vmem:[%s866_s1 + $0x4] sm:$0xf0]  ;;  %v459_v28 = vld [vmem:[%s866_s1 + $0x80] sm:$0xf]  ;;  %v480_v30 = vor.u32 %v545_v22, %v477_v23  ;;  %v525_v33 = vld [vmem:[%s866_s1 + $0x4] sm:$0xf] }
  0x16   :  { %313 = vmatpush.bf16.msra.mxu3 %v424_v0  ;;  %v542_v32 = vld [vmem:[%s866_s1 + $0x84] sm:$0xf0] }
  0x18   :  { %257 = vmatpush.bf16.msra.mxu0 %v412_v8 }
  0x19   :  { %331 = vmatpush.bf16.msrb.mxu2 %v496_v1  ;;  %276 = vmatpush.bf16.msra.mxu1 %v476_v11 }
  0x1a   :  { %314 = vmatpush.bf16.msra.mxu3 %v416_v15 }
  0x1d   :  { %332 = vmatpush.bf16.msrb.mxu2 %v488_v16 }
  0x1e   :  { %8 = vsyncpa [#allocation3], 0  ;;  %v397_v35 = vld [vmem:[%s866_s1 + $0x8] sm:$0xf0]  ;;  %v543_v36 = vld [vmem:[%s866_s1 + $0x94] sm:$0xf]  ;;  %522 = vmatmul.msk.bf16.gmra.mxu2 %vm238_vm1, %v33_v24  ;;  %258 = vmatpush.bf16.msra.mxu0 %v404_v25  ;;  %v396_v38 = vor.u32 %v526_v27, %v395_v9  ;;  %v460_v41 = vor.u32 %v542_v32, %v459_v28 }
  0x1f   :  { %v469_v37 = vld [vmem:[%s866_s1 + $0x98] sm:$0xf0]  ;;  %v16_v39 = vld [vmem:[%s865_s0] sm:$0xff]  ;;  %277 = vmatpush.bf16.msra.mxu1 %v468_v26  ;;  %v17_v42 = vld [vmem:[%s865_s0 + $0x8] sm:$0xff]  ;;  %315 = vmatpush.bf16.msra.mxu3 %v408_v29  ;;  %v400_v44 = vor.u32 %v525_v33, %v397_v35  ;;  %v250_v46 = vsel %vm245_vm0, %v205_v34, 0  ;;  %vm367_vm2 = vcmask 867328  }
  0x20   :  { %v19_v40 = vld [vmem:[%s865_s0 + $0x18] sm:$0xff]  ;;  %v20_v43 = vld [vmem:[%s865_s0 + $0x20] sm:$0xff]  ;;  %v472_v45 = vor.u32 %v543_v36, %v469_v37  ;;  %v461_v49 = vld [vmem:[%s866_s1 + $0x88] sm:$0xf0]  ;;  %s381_s7 = sshll.u32 %s868_s3, 4  ;;  %s588_s8 = smov 256   ;;  %s382_s7 = int_to_ptr.hbm [resolvable:$true] %s381_s7 }
  0x21   :  { %333 = vmatpush.bf16.msrb.mxu2 %v480_v30  ;;  %v28_v47 = vpack.c.bf16 %v19_v40, %v16_v39  ;;  %v541_v48 = vld [vmem:[%s866_s1 + $0x84] sm:$0xf]  ;;  %v29_v50 = vpack.c.bf16 %v20_v43, %v17_v42  ;;  %v22_v52 = vld [vmem:[%s865_s0 + $0x30] sm:$0xff]  ;;  %v25_v53 = vld [vmem:[%s865_s0 + $0x48] sm:$0xff]  ;;  %s589_s9 = smov 16  }
  0x22   :  { %259 = vmatpush.bf16.msra.mxu0 %v396_v38  ;;  %v464_v51 = vor.u32 %v541_v48, %v461_v49  ;;  %v23_v54 = vld [vmem:[%s865_s0 + $0x38] sm:$0xff]  ;;  %v26_v55 = vld [vmem:[%s865_s0 + $0x50] sm:$0xff]  ;;  %v31_v56 = vpack.c.bf16 %v25_v53, %v22_v52  ;;  %v67_v60 = vld [vmem:[%s867_s2] sm:$0x3]  ;;  %s587_s0 = smov [#allocation2]  }
  0x23   :  { %278 = vmatpush.bf16.msra.mxu1 %v460_v41  ;;  %316 = vmatpush.bf16.msra.mxu3 %v400_v44  ;;  %v32_v57 = vpack.c.bf16 %v26_v55, %v23_v54  ;;  %v69_v61 = vperm.slane %v67_v60, 0  ;;  %v70_v18 = vperm.slane %v67_v60, 1  ;;  %s379_s2 = sshll.u32 %s587_s0, 4  ;;  %s380_s2 = int_to_ptr.vmem [resolvable:$true] %s379_s2 }
  0x25   :  { %334 = vmatpush.bf16.msrb.mxu2 %v472_v45  ;;  %260 = vmatmul.bf16.vlgmr.msra.gmra.mxu0 %v28_v47 }
  0x26   :  { %354 = vmatpush.bf16.msrb.mxu0 %v250_v46  ;;  %279 = vmatmul.bf16.vlgmr.msra.gmra.mxu1 %v29_v50 }
  0x27   :  { %557 = vmatpush.bf16.msrb.mxu1 %v250_v46  ;;  %317 = vmatmul.bf16.vlgmr.msra.gmra.mxu3 %v28_v47 }
  0x29   :  { %335 = vmatpush.bf16.msrb.mxu2 %v464_v51 }
  0x2e   :  { %336 = vmatmul.bf16.vlgmr.msrb.gmra.mxu2 %v29_v50 }
  0x35   :  { %265 = vmatmul.bf16.gmra.mxu0 %v31_v56 }
  0x36   :  { %284 = vmatmul.bf16.gmra.mxu1 %v32_v57 }
  0x37   :  { %322 = vmatmul.bf16.gmra.mxu3 %v31_v56 }
  0x3e   :  { %341 = vmatmul.bf16.gmra.mxu2 %v32_v57 }
  0x45   :  { %523 = vmatmul.msk.bf16.vlgmr.msrb.gmra.mxu0 %vm238_vm1, %v677_v31 }
  0x46   :  { %524 = vmatmul.msk.bf16.vlgmr.msrb.gmra.mxu1 %vm238_vm1, %v33_v24 }
  0x8f   :  { %v299_v58 = vpop.f32.mrf.mxu2 }
  0x97   :  { %v301_v59 = vpop.f32.mrf.mxu2 }
  0xa1   :  { %v304_v62 = vpop.f32.mrf.mxu2 }
  0xa2   :  { %v261_v63 = vpop.f32.mrf.mxu0 }
  0xa3   :  { %v262_v0 = vadd.f32 %v261_v63, %v69_v61  ;;  %v280_v1 = vpop.f32.mrf.mxu1 }
  0xa5   :  { %v281_v2 = vadd.f32 %v280_v1, %v262_v0 }
  0xa7   :  { %v300_v3 = vadd.f32 %v299_v58, %v281_v2 }
  0xa9   :  { %366 = vst [vmem:[#allocation2] sm:$0xff] %v300_v3  ;;  %v306_v4 = vpop.f32.mrf.mxu2 }
  0xaa   :  { %v318_v5 = vpop.f32.mrf.mxu3  ;;  %v263_v6 = vpop.f32.mrf.mxu0 }
  0xab   :  { %v264_v31 = vadd.f32 %v263_v6, %v69_v61  ;;  %v282_v7 = vpop.f32.mrf.mxu1  ;;  %v319_v24 = vadd.f32 %v318_v5, %v70_v18 }
  0xad   :  { %v283_v8 = vadd.f32 %v282_v7, %v264_v31 }
  0xaf   :  { %v302_v10 = vadd.f32 %v301_v59, %v283_v8 }
  0xb1   :  { %369 = vst [vmem:[#allocation2 + $0x10] sm:$0xff] %v302_v10  ;;  %v337_v11 = vpop.f32.mrf.mxu2 }
  0xb2   :  { %v320_v12 = vpop.f32.mrf.mxu3  ;;  %v266_v13 = vpop.f32.mrf.mxu0  ;;  %v338_v27 = vadd.f32 %v337_v11, %v319_v24 }
  0xb3   :  { %v267_v14 = vadd.f32 %v266_v13, %v69_v61  ;;  %v285_v15 = vpop.f32.mrf.mxu1  ;;  %v321_v36 = vadd.f32 %v320_v12, %v70_v18 }
  0xb5   :  { %v286_v16 = vadd.f32 %v285_v15, %v267_v14 }
  0xb7   :  { %v305_v17 = vadd.f32 %v304_v62, %v286_v16 }
  0xb9   :  { %371 = vst [vmem:[#allocation2 + $0x20] sm:$0xff] %v305_v17  ;;  %v339_v19 = vpop.f32.mrf.mxu2 }
  0xba   :  { %v268_v20 = vpop.f32.mrf.mxu0  ;;  %v323_v21 = vpop.f32.mrf.mxu3  ;;  %v340_v38 = vadd.f32 %v339_v19, %v321_v36 }
  0xbb   :  { %v269_v22 = vadd.f32 %v268_v20, %v69_v61  ;;  %v287_v23 = vpop.f32.mrf.mxu1  ;;  %v324_v26 = vadd.f32 %v323_v21, %v70_v18 }
  0xbd   :  { %v288_v25 = vadd.f32 %v287_v23, %v269_v22 }
  0xbf   :  { %v307_v9 = vadd.f32 %v306_v4, %v288_v25 }
  0xc1   :  { %373 = vst [vmem:[#allocation2 + $0x30] sm:$0xff] %v307_v9  ;;  %v342_v28 = vpop.f32.mrf.mxu2 }
  0xc2   :  { %v343_v29 = vadd.f32 %v342_v28, %v324_v26  ;;  %v356_v30 = vpop.f32.mrf.mxu0  ;;  %v325_v35 = vpop.f32.mrf.mxu3 }
  0xc3   :  { %v357_v32 = vadd.f32 %v356_v30, %v338_v27  ;;  %v361_v33 = vpop.f32.mrf.mxu1  ;;  %v326_v37 = vadd.f32 %v325_v35, %v70_v18 }
  0xc4   :  { %v362_v34 = vadd.f32 %v361_v33, %v343_v29 }
  0xc5   :  { %368 = vst.msk [vmem:[#allocation2 + $0x8] sm:$0xff] %vm367_vm2, %v357_v32 }
  0xc6   :  { %372 = vst.msk [vmem:[#allocation2 + $0x28] sm:$0xff] %vm367_vm2, %v362_v34 }
  0xc9   :  { %v344_v39 = vpop.f32.mrf.mxu2 }
  0xca   :  { %v345_v40 = vadd.f32 %v344_v39, %v326_v37  ;;  %v358_v41 = vpop.f32.mrf.mxu0 }
  0xcb   :  { %v359_v42 = vadd.f32 %v358_v41, %v340_v38  ;;  %v363_v43 = vpop.f32.mrf.mxu1 }
  0xcc   :  { %v364_v44 = vadd.f32 %v363_v43, %v345_v40 }
  0xcd   :  { %370 = vst.msk [vmem:[#allocation2 + $0x18] sm:$0xff] %vm367_vm2, %v359_v42 }
  0xce   :  { %374 = vst.msk [vmem:[#allocation2 + $0x38] sm:$0xff] %vm367_vm2, %v364_v44 }
  0xcf   :  { %387 = dma.vmem_to_hbm [thread:$0]  %s380_s2, 1024, %s382_s7, [#allocation3], %s588_s8, %s588_s8, %s589_s9  }
  0xd0   :  { %585 = dma.done.wait [#allocation3], 1024  }
  0xd1   :  { %586 = vsyncadd [#allocation3], 4294966272 }
  0xd2   :  { %392 = vsyncpa [#allocation3], 1 }

</bundles_post_ra>
